<compile_context>
chip_gen: v6e
topology: v6e:2x2x1
jax: 0.10.0
libtpu: 0.0.40
codegen_flags: <defaults>
</compile_context>

<pallas_src>
import functools
import numpy as np
import jax
import jax.numpy as jnp
from jax.experimental import pallas as pl
from jax.experimental.pallas import tpu as pltpu

HID = 128    # hidden width of the stand-in 1x1-conv MLP blocks
C_IMG = 3    # image channels


# ------------------------------------------------------------------ tile helpers
def _row_tile(rows, cap=512):
    if rows <= cap:
        return rows
    for t in (cap, 256, 128, 64, 32, 16, 8):
        if rows % t == 0:
            return t
    return rows


def _lane_tile(s, cap=2048):
    if s <= cap:
        return s
    for t in (cap, 1024, 512, 256, 128):
        if s % t == 0:
            return t
    return s


# --------------------------------------------------------------- Haar DWT / IWT
# Input is viewed (free reshape) as (rows, 2W) with each row = [even image row ||
# odd image row]; the column butterfly + de-interleave is a matmul with small
# 0/±1 matrices (S_h, D_h), so no strided gathers and no wrapper transposes.

def _dwt_matrices(w):
    wh = w // 2
    j = np.arange(wh)
    sh = np.zeros((w, wh), np.float32)
    sh[2 * j, j] = 1.0
    sh[2 * j + 1, j] = 1.0
    dh = np.zeros((w, wh), np.float32)
    dh[2 * j, j] = -1.0
    dh[2 * j + 1, j] = 1.0
    return jnp.asarray(np.stack([sh, dh]))          # (2, W, Wh)


def _dwt_kernel(x_ref, m_ref, ll_ref, high_ref, *, pre_transform):
    w = m_ref.shape[1]
    x = x_ref[...]                                   # (R, 2W)
    xe = x[:, :w]                                    # even image rows
    xo = x[:, w:]                                    # odd image rows
    sv = xe + xo
    dv = xo - xe
    sh = m_ref[0]                                    # (W, Wh) pair-sum
    dh = m_ref[1]                                    # (W, Wh) pair-diff
    # With pre_transform (2x-1): the 2x cancels the 0.5 Haar scale, and the -1
    # offsets cancel in every band except LL (-> -2).
    scale = 1.0 if pre_transform else 0.5
    ll = scale * jnp.dot(sv, sh, preferred_element_type=jnp.float32)
    if pre_transform:
        ll = ll - 2.0
    hl = scale * jnp.dot(sv, dh, preferred_element_type=jnp.float32)
    lh = scale * jnp.dot(dv, sh, preferred_element_type=jnp.float32)
    hh = scale * jnp.dot(dv, dh, preferred_element_type=jnp.float32)
    ll_ref[...] = ll
    high_ref[0] = hl
    high_ref[1] = lh
    high_ref[2] = hh


def dwt(x, *, pre_transform=False):
    """(N, C, H, W) -> (LL (N,C,H/2,W/2), high (3N,C,H/2,W/2) band-major)."""
    n, c, h, w = x.shape
    hh, wh = h // 2, w // 2
    rows = n * c * hh
    x2d = x.reshape(rows, 2 * w)                     # free reshape, no transpose
    m = _dwt_matrices(w)
    tr = _row_tile(rows)
    kernel = functools.partial(_dwt_kernel, pre_transform=pre_transform)
    ll, high = pl.pallas_call(
        kernel,
        out_shape=(jax.ShapeDtypeStruct((rows, wh), jnp.float32),
                   jax.ShapeDtypeStruct((3, rows, wh), jnp.float32)),
        grid=(rows // tr,),
        in_specs=[
            pl.BlockSpec((tr, 2 * w), lambda i: (i, 0)),
            pl.BlockSpec((2, w, wh), lambda i: (0, 0, 0)),       # resident
        ],
        out_specs=(
            pl.BlockSpec((tr, wh), lambda i: (i, 0)),
            pl.BlockSpec((3, tr, wh), lambda i: (0, i, 0)),
        ),
        compiler_params=pltpu.CompilerParams(dimension_semantics=("parallel",)),
    )(x2d, m)
    return ll.reshape(n, c, hh, wh), high.reshape(3 * n, c, hh, wh)


def _iwt_matrices(wq):
    w = 2 * wq
    j = np.arange(wq)
    sht = np.zeros((wq, w), np.float32)
    sht[j, 2 * j] = 1.0
    sht[j, 2 * j + 1] = 1.0
    dht = np.zeros((wq, w), np.float32)
    dht[j, 2 * j] = -1.0
    dht[j, 2 * j + 1] = 1.0
    return jnp.asarray(np.stack([sht, dht]))          # (2, Wq, W)


def _iwt_kernel(ll_ref, high_ref, m_ref, o_ref, *, post_transform):
    x1 = 0.5 * ll_ref[...]                            # LL
    x2 = 0.5 * high_ref[0]                            # HL
    x3 = 0.5 * high_ref[1]                            # LH
    x4 = 0.5 * high_ref[2]                            # HH
    sht = m_ref[0]                                    # (Wq, W) place into col pairs
    dht = m_ref[1]
    a = (jnp.dot(x1, sht, preferred_element_type=jnp.float32)
         + jnp.dot(x2, dht, preferred_element_type=jnp.float32))
    b = (jnp.dot(x3, sht, preferred_element_type=jnp.float32)
         + jnp.dot(x4, dht, preferred_element_type=jnp.float32))
    even = a - b                                      # output row 2i
    odd = a + b                                       # output row 2i+1
    if post_transform:                                # fused clip((y+1)/2, 0, 1)
        even = jnp.clip((even + 1.0) * 0.5, 0.0, 1.0)
        odd = jnp.clip((odd + 1.0) * 0.5, 0.0, 1.0)
    o_ref[...] = jnp.concatenate([even, odd], axis=-1)   # one lane-dense store


def iwt(ll, high, *, post_transform=False):
    """(LL (N,C,Hq,Wq), high (3N,C,Hq,Wq)) -> (N, C, 2Hq, 2Wq); no concat needed."""
    n, c, hq, wq = ll.shape
    rows = n * c * hq
    w = 2 * wq
    ll2d = ll.reshape(rows, wq)                       # free reshape
    high3d = high.reshape(3, rows, wq)                # free reshape
    m = _iwt_matrices(wq)
    tr = _row_tile(rows)
    kernel = functools.partial(_iwt_kernel, post_transform=post_transform)
    out = pl.pallas_call(
        kernel,
        out_shape=jax.ShapeDtypeStruct((rows, 2 * w), jnp.float32),
        grid=(rows // tr,),
        in_specs=[
            pl.BlockSpec((tr, wq), lambda i: (i, 0)),
            pl.BlockSpec((3, tr, wq), lambda i: (0, i, 0)),
            pl.BlockSpec((2, wq, w), lambda i: (0, 0, 0)),        # resident
        ],
        out_specs=pl.BlockSpec((tr, 2 * w), lambda i: (i, 0)),
        compiler_params=pltpu.CompilerParams(dimension_semantics=("parallel",)),
    )(ll2d, high3d, m)
    return out.reshape(n, c, 2 * hq, w)               # free reshape


# ------------------------------------------------ HFRM stand-in (Pallas matmul)
def _hfrm_kernel(x_ref, w1_ref, b1_ref, w2_ref, b2_ref, o_ref):
    w1 = w1_ref[...].astype(jnp.bfloat16)             # (HID, 3)
    w2 = w2_ref[...].astype(jnp.bfloat16)             # (3, HID)
    b1 = b1_ref[...]
    b2 = b2_ref[...]
    # One kernel invocation handles all 3N band images (no per-image grid steps).
    for m in range(x_ref.shape[0]):
        x = x_ref[m]                                   # (3, TS) pixels on lanes
        h = jnp.maximum(
            jnp.dot(w1, x.astype(jnp.bfloat16),
                    preferred_element_type=jnp.float32) + b1, 0.0)
        o_ref[m] = x + jnp.dot(w2, h.astype(jnp.bfloat16),
                               preferred_element_type=jnp.float32) + b2


def hfrm_apply(x, p):
    # TODO(synk): HFRM's real architecture is not provided in the reference file;
    # this is a deterministic residual 1x1-conv MLP stand-in with identical I/O shapes.
    m, c, hh, ww = x.shape
    s = hh * ww
    xr = x.reshape(m, c, s)
    ts = _lane_tile(s)
    out = pl.pallas_call(
        _hfrm_kernel,
        out_shape=jax.ShapeDtypeStruct((m, c, s), jnp.float32),
        grid=(s // ts,),
        in_specs=[
            pl.BlockSpec((m, c, ts), lambda i: (0, 0, i)),
            pl.BlockSpec((HID, c), lambda i: (0, 0)),             # resident weights
            pl.BlockSpec((HID, 1), lambda i: (0, 0)),
            pl.BlockSpec((c, HID), lambda i: (0, 0)),
            pl.BlockSpec((c, 1), lambda i: (0, 0)),
        ],
        out_specs=pl.BlockSpec((m, c, ts), lambda i: (0, 0, i)),
        compiler_params=pltpu.CompilerParams(dimension_semantics=("parallel",)),
    )(xr, p["w1"], p["b1"], p["w2"], p["b2"])
    return out.reshape(m, c, hh, ww)


# --------------------------- fused DDIM sampling loop (UNet stand-in + update)
def _ddim_loop_kernel(coef_ref, xcond_ref, noise_ref, bias_ref,
                      w1c_ref, w1x_ref, w2_ref, b2_ref, out_ref,
                      hcond_ref, xt_ref):
    t = pl.program_id(0)

    @pl.when(t == 0)
    def _():
        xt_ref[...] = noise_ref[...]
        # x_cond contribution to the first layer is constant across timesteps.
        hcond_ref[...] = jnp.dot(w1c_ref[...].astype(jnp.bfloat16),
                                 xcond_ref[...].astype(jnp.bfloat16),
                                 preferred_element_type=jnp.float32)

    # TODO(synk): DiffusionUNet's real architecture is not provided; this is a
    # time-conditioned 1x1-conv MLP stand-in on concat([x_cond, xt], channel).
    h = jnp.tanh(jnp.dot(w1x_ref[...].astype(jnp.bfloat16),
                         xt_ref[...].astype(jnp.bfloat16),
                         preferred_element_type=jnp.float32)
                 + hcond_ref[...] + bias_ref[t])
    et = jnp.dot(w2_ref[...].astype(jnp.bfloat16), h.astype(jnp.bfloat16),
                 preferred_element_type=jnp.float32) + b2_ref[...]

    # DDIM update (eta = 0) with host-precomputed scalars:  x_next = k1*x + k2*et
    k1 = coef_ref[2 * t]
    k2 = coef_ref[2 * t + 1]
    xt_ref[...] = k1 * xt_ref[...] + k2 * et

    @pl.when(t == pl.num_programs(0) - 1)
    def _():
        out_ref[...] = xt_ref[...]


def sample_training(x_cond, betas, unet_params, noise_key, num_timesteps, eta=0.0):
    skip = num_timesteps // 10
    seq = list(range(0, num_timesteps, skip))
    seq_next = [-1] + seq[:-1]
    steps = list(zip(reversed(seq), reversed(seq_next)))
    T = len(steps)

    n, c, hq, wq = x_cond.shape
    L = n * hq * wq                                   # batch + pixels folded on lanes

    # compute_alpha: cumprod of (1 - [0, betas...]) indexed at t+1; fold the whole
    # eta=0 DDIM update into two scalars per step (sqrt/div done on the host).
    alphas_cum = np.cumprod(np.concatenate([[1.0], 1.0 - np.asarray(betas, np.float64)]))
    coefs = np.zeros((2 * T,), np.float32)            # 1-D (long-axis) SMEM table
    for k, (i, j) in enumerate(steps):
        at, at_next = float(alphas_cum[i + 1]), float(alphas_cum[j + 1])
        coefs[2 * k] = np.sqrt(at_next / at)
        coefs[2 * k + 1] = np.sqrt(1.0 - at_next) - np.sqrt(at_next * (1.0 - at) / at)

    # time embedding table, pre-folded with b1 -> one resident (T, HID, 1) table.
    half = HID // 2
    freqs = np.exp(-np.log(10000.0) * np.arange(half) / half)
    temb = np.stack([np.concatenate([np.sin(i * freqs), np.cos(i * freqs)])
                     for i, _ in steps]).astype(np.float32)              # (T, HID)
    bias_t = jnp.asarray(temb)[:, :, None] + unet_params["b1"][None]     # (T, HID, 1)

    # channel-major layout (C, n*s): lane-dense across the whole batch; the two
    # tiny transposes sit outside the T-step loop.
    x_cond_cm = jnp.transpose(x_cond, (1, 0, 2, 3)).reshape(c, L)
    noise_cm = jax.random.normal(noise_key, (c, L), jnp.float32)

    out = pl.pallas_call(
        _ddim_loop_kernel,
        out_shape=jax.ShapeDtypeStruct((c, L), jnp.float32),
        grid=(T,),
        in_specs=[
            pl.BlockSpec(memory_space=pltpu.MemorySpace.SMEM),            # coefs
            pl.BlockSpec((c, L), lambda t: (0, 0)),                       # x_cond
            pl.BlockSpec((c, L), lambda t: (0, 0)),                       # init noise
            pl.BlockSpec((T, HID, 1), lambda t: (0, 0, 0)),               # resident bias
            pl.BlockSpec((HID, c), lambda t: (0, 0)),                     # w1 (cond half)
            pl.BlockSpec((HID, c), lambda t: (0, 0)),                     # w1 (xt half)
            pl.BlockSpec((c, HID), lambda t: (0, 0)),                     # w2
            pl.BlockSpec((c, 1), lambda t: (0, 0)),                       # b2
        ],
        out_specs=pl.BlockSpec((c, L), lambda t: (0, 0)),
        scratch_shapes=[pltpu.VMEM((HID, L), jnp.float32),                # hoisted h_cond
                        pltpu.VMEM((c, L), jnp.float32)],                 # resident xt
        compiler_params=pltpu.CompilerParams(dimension_semantics=("arbitrary",)),
    )(jnp.asarray(coefs), x_cond_cm, noise_cm, bias_t,
      unet_params["w1c"], unet_params["w1x"], unet_params["w2"], unet_params["b2"])
    return jnp.transpose(out.reshape(c, n, hq, wq), (1, 0, 2, 3))


# --------------------------------------------------------------- diffusion glue
def get_beta_schedule(beta_schedule, *, beta_start, beta_end, num_diffusion_timesteps):
    if beta_schedule == "linear":
        betas = np.linspace(beta_start, beta_end, num_diffusion_timesteps, dtype=np.float64)
    elif beta_schedule == "quad":
        betas = np.linspace(beta_start ** 0.5, beta_end ** 0.5,
                            num_diffusion_timesteps, dtype=np.float64) ** 2
    elif beta_schedule == "const":
        betas = beta_end * np.ones(num_diffusion_timesteps, dtype=np.float64)
    else:
        raise NotImplementedError(beta_schedule)
    assert betas.shape == (num_diffusion_timesteps,)
    return betas


def net_forward(x, params, betas, num_timesteps, noise_key):
    """Eval-mode Net.forward: returns {'pred_x': (N, 3, H, W)}."""
    input_img = x[:, :3, :, :]
    ll0, high0 = dwt(input_img, pre_transform=True)           # data_transform fused
    high0 = hfrm_apply(high0, params["hfrm0"])
    ll_ll, high1 = dwt(ll0)
    high1 = hfrm_apply(high1, params["hfrm1"])
    # TODO(synk): training branch (noisy-target UNet call + gt wavelet pyramid) not
    # implemented; only the inference path (self.training == False) is reproduced.
    denoise_ll_ll = sample_training(ll_ll, betas, params["unet"], noise_key, num_timesteps)
    pred_ll = iwt(denoise_ll_ll, high1)
    pred_x = iwt(pred_ll, high0, post_transform=True)          # inverse_data_transform fused
    return {"pred_x": pred_x}


def init_params(key):
    def mlp(k):
        k1, k2 = jax.random.split(k)
        return {"w1": 0.05 * jax.random.normal(k1, (HID, C_IMG), jnp.float32),
                "b1": jnp.zeros((HID, 1), jnp.float32),
                "w2": 0.05 * jax.random.normal(k2, (C_IMG, HID), jnp.float32),
                "b2": jnp.zeros((C_IMG, 1), jnp.float32)}
    k0, k1, k2 = jax.random.split(key, 3)
    ka, kb, kc = jax.random.split(k2, 3)
    unet = {"w1c": 0.05 * jax.random.normal(ka, (HID, C_IMG), jnp.float32),
            "w1x": 0.05 * jax.random.normal(kb, (HID, C_IMG), jnp.float32),
            "b1": jnp.zeros((HID, 1), jnp.float32),
            "w2": 0.05 * jax.random.normal(kc, (C_IMG, HID), jnp.float32),
            "b2": jnp.zeros((C_IMG, 1), jnp.float32)}
    return {"hfrm0": mlp(k0), "hfrm1": mlp(k1), "unet": unet}


if __name__ == "__main__":
    key = jax.random.PRNGKey(0)
    kx, kp, kn = jax.random.split(key, 3)
    # NCHW input; channels 0:3 are the low-light image (3: would be gt in training).
    x = jax.random.uniform(kx, (2, 6, 16, 16), dtype=jnp.float32)
    params = init_params(kp)
    num_timesteps = 20
    betas = get_beta_schedule("linear", beta_start=0.0001, beta_end=0.02,
                              num_diffusion_timesteps=num_timesteps)
    out = net_forward(x, params, betas, num_timesteps, kn)
    jax.block_until_ready(out["pred_x"])
    assert out["pred_x"].shape == (2, 3, 16, 16)
    assert bool(jnp.all(out["pred_x"] >= 0.0)) and bool(jnp.all(out["pred_x"] <= 1.0))
    print("KERNEL_OK")
</pallas_src>

<mosaic_0001>
module attributes {stable_mosaic.version = 11 : i64} {
  func.func @_dwt_kernel(%arg0: i32, %arg1: memref<48x32xf32, #tpu.memory_space<vmem>>, %arg2: memref<2x16x8xf32, #tpu.memory_space<vmem>>, %arg3: memref<48x8xf32, #tpu.memory_space<vmem>>, %arg4: memref<3x48x8xf32, #tpu.memory_space<vmem>>) attributes {dimension_semantics = [#tpu.dimension_semantics<parallel>], iteration_bounds = array<i64: 1>, scalar_prefetch = 0 : i64, scratch_operands = 0 : i64, tpu.core_type = #tpu.core_type<tc>, window_params = [{transform_indices = @transform_0, window_bounds = array<i64: 48, 32>}, {pipeline_mode = #tpu.pipeline_mode<synchronous>, transform_indices = @transform_1, window_bounds = array<i64: 2, 16, 8>}, {transform_indices = @transform_2, window_bounds = array<i64: 48, 8>}, {transform_indices = @transform_3, window_bounds = array<i64: 3, 48, 8>}]} {
    %c0 = arith.constant 0 : index
    %c0_0 = arith.constant 0 : index
    %0 = vector.load %arg1[%c0, %c0_0] : memref<48x32xf32, #tpu.memory_space<vmem>>, vector<48x32xf32>
    %1 = vector.extract_strided_slice %0 {offsets = [0, 0], sizes = [48, 16], strides = [1, 1]} : vector<48x32xf32> to vector<48x16xf32>
    %2 = vector.extract_strided_slice %0 {offsets = [0, 16], sizes = [48, 16], strides = [1, 1]} : vector<48x32xf32> to vector<48x16xf32>
    %3 = arith.addf %1, %2 : vector<48x16xf32>
    %4 = arith.subf %2, %1 : vector<48x16xf32>
    %c0_1 = arith.constant 0 : index
    %c0_2 = arith.constant 0 : index
    %c0_3 = arith.constant 0 : index
    %5 = vector.load %arg2[%c0_1, %c0_2, %c0_3] : memref<2x16x8xf32, #tpu.memory_space<vmem>>, vector<1x16x8xf32>
    %6 = vector.shape_cast %5 : vector<1x16x8xf32> to vector<16x8xf32>
    %c1 = arith.constant 1 : index
    %c0_4 = arith.constant 0 : index
    %c0_5 = arith.constant 0 : index
    %7 = vector.load %arg2[%c1, %c0_4, %c0_5] : memref<2x16x8xf32, #tpu.memory_space<vmem>>, vector<1x16x8xf32>
    %8 = vector.shape_cast %7 : vector<1x16x8xf32> to vector<16x8xf32>
    %cst = arith.constant dense<0.000000e+00> : vector<48x8xf32>
    %9 = tpu.matmul %3, %6, %cst {dimension_numbers = #tpu.dot_dimension_numbers<[1], [0], [0], [1], [0, 0, 1, 1], [], []>} : vector<48x16xf32>, vector<16x8xf32>, vector<48x8xf32> -> vector<48x8xf32>
    %cst_6 = arith.constant 1.000000e+00 : f32
    %10 = vector.broadcast %cst_6 : f32 to vector<48x8xf32>
    %11 = arith.mulf %10, %9 : vector<48x8xf32>
    %cst_7 = arith.constant 2.000000e+00 : f32
    %12 = vector.broadcast %cst_7 : f32 to vector<48x8xf32>
    %13 = arith.subf %11, %12 : vector<48x8xf32>
    %cst_8 = arith.constant dense<0.000000e+00> : vector<48x8xf32>
    %14 = tpu.matmul %3, %8, %cst_8 {dimension_numbers = #tpu.dot_dimension_numbers<[1], [0], [0], [1], [0, 0, 1, 1], [], []>} : vector<48x16xf32>, vector<16x8xf32>, vector<48x8xf32> -> vector<48x8xf32>
    %cst_9 = arith.constant 1.000000e+00 : f32
    %15 = vector.broadcast %cst_9 : f32 to vector<48x8xf32>
    %16 = arith.mulf %15, %14 : vector<48x8xf32>
    %cst_10 = arith.constant dense<0.000000e+00> : vector<48x8xf32>
    %17 = tpu.matmul %4, %6, %cst_10 {dimension_numbers = #tpu.dot_dimension_numbers<[1], [0], [0], [1], [0, 0, 1, 1], [], []>} : vector<48x16xf32>, vector<16x8xf32>, vector<48x8xf32> -> vector<48x8xf32>
    %cst_11 = arith.constant 1.000000e+00 : f32
    %18 = vector.broadcast %cst_11 : f32 to vector<48x8xf32>
    %19 = arith.mulf %18, %17 : vector<48x8xf32>
    %cst_12 = arith.constant dense<0.000000e+00> : vector<48x8xf32>
    %20 = tpu.matmul %4, %8, %cst_12 {dimension_numbers = #tpu.dot_dimension_numbers<[1], [0], [0], [1], [0, 0, 1, 1], [], []>} : vector<48x16xf32>, vector<16x8xf32>, vector<48x8xf32> -> vector<48x8xf32>
    %cst_13 = arith.constant 1.000000e+00 : f32
    %21 = vector.broadcast %cst_13 : f32 to vector<48x8xf32>
    %22 = arith.mulf %21, %20 : vector<48x8xf32>
    %c0_14 = arith.constant 0 : index
    %c0_15 = arith.constant 0 : index
    %23 = vector.load %arg3[%c0_14, %c0_15] : memref<48x8xf32, #tpu.memory_space<vmem>>, vector<48x8xf32>
    tpu.vector_store %arg3[%c0_14, %c0_15], %13 {strides = array<i32>} : memref<48x8xf32, #tpu.memory_space<vmem>>, vector<48x8xf32>,
    %c0_16 = arith.constant 0 : index
    %c0_17 = arith.constant 0 : index
    %c0_18 = arith.constant 0 : index
    %24 = vector.load %arg4[%c0_16, %c0_17, %c0_18] : memref<3x48x8xf32, #tpu.memory_space<vmem>>, vector<1x48x8xf32>
    %25 = vector.shape_cast %24 : vector<1x48x8xf32> to vector<48x8xf32>
    %26 = vector.shape_cast %16 : vector<48x8xf32> to vector<1x48x8xf32>
    tpu.vector_store %arg4[%c0_16, %c0_17, %c0_18], %26 {strides = array<i32>} : memref<3x48x8xf32, #tpu.memory_space<vmem>>, vector<1x48x8xf32>,
    %c1_19 = arith.constant 1 : index
    %c0_20 = arith.constant 0 : index
    %c0_21 = arith.constant 0 : index
    %27 = vector.load %arg4[%c1_19, %c0_20, %c0_21] : memref<3x48x8xf32, #tpu.memory_space<vmem>>, vector<1x48x8xf32>
    %28 = vector.shape_cast %27 : vector<1x48x8xf32> to vector<48x8xf32>
    %29 = vector.shape_cast %19 : vector<48x8xf32> to vector<1x48x8xf32>
    tpu.vector_store %arg4[%c1_19, %c0_20, %c0_21], %29 {strides = array<i32>} : memref<3x48x8xf32, #tpu.memory_space<vmem>>, vector<1x48x8xf32>,
    %c2 = arith.constant 2 : index
    %c0_22 = arith.constant 0 : index
    %c0_23 = arith.constant 0 : index
    %30 = vector.load %arg4[%c2, %c0_22, %c0_23] : memref<3x48x8xf32, #tpu.memory_space<vmem>>, vector<1x48x8xf32>
    %31 = vector.shape_cast %30 : vector<1x48x8xf32> to vector<48x8xf32>
    %32 = vector.shape_cast %22 : vector<48x8xf32> to vector<1x48x8xf32>
    tpu.vector_store %arg4[%c2, %c0_22, %c0_23], %32 {strides = array<i32>} : memref<3x48x8xf32, #tpu.memory_space<vmem>>, vector<1x48x8xf32>,
    return
  }
  func.func @transform_0(%arg0: i32) -> (i32, i32) {
    %c0_i32 = arith.constant 0 : i32
    %c0_i32_0 = arith.constant 0 : i32
    return %arg0, %c0_i32 : i32, i32
  }
  func.func @transform_1(%arg0: i32) -> (i32, i32, i32) {
    %c0_i32 = arith.constant 0 : i32
    %c0_i32_0 = arith.constant 0 : i32
    %c0_i32_1 = arith.constant 0 : i32
    %c0_i32_2 = arith.constant 0 : i32
    return %c0_i32, %c0_i32_0, %c0_i32_1 : i32, i32, i32
  }
  func.func @transform_2(%arg0: i32) -> (i32, i32) {
    %c0_i32 = arith.constant 0 : i32
    %c0_i32_0 = arith.constant 0 : i32
    return %arg0, %c0_i32 : i32, i32
  }
  func.func @transform_3(%arg0: i32) -> (i32, i32, i32) {
    %c0_i32 = arith.constant 0 : i32
    %c0_i32_0 = arith.constant 0 : i32
    %c0_i32_1 = arith.constant 0 : i32
    return %c0_i32, %arg0, %c0_i32_0 : i32, i32, i32
  }
}

</mosaic_0001>

<bundles_post_ra>
// kernel: tpu_custom_call.1
= control target key start
LH: loop header
LB: loop body
LE: loop exit
PB: predicated region body
PF: predicated region fallthrough
CT: control target
= control target key end

     0   :  { %s678_s16 = smov 16   ;;  %vm78_vm0 = vcmask 130048   ;;  %vm513_vm1 = vcmask 64512   ;;  %s868_s0 = inlined_call_operand.vmem [shape: f32[48,32], index: 0, kind: input, shape index: {}]   ;;  %s869_s1 = inlined_call_operand.vmem [shape: f32[2,16,8], index: 1, kind: input, shape index: {}]   ;;  %s870_s3 = inlined_call_operand.vmem [shape: f32[3,48,8], index: 3, kind: output, shape index: {1}]   ;;  %s871_s2 = inlined_call_operand.vmem [shape: f32[48,8], index: 2, kind: output, shape index: {0}]  }
   0x1   :  { %v13_v0 = vld [vmem:[%s868_s0] sm:$0xff]  ;;  %v706_v1 = vld [vmem:[%s868_s0 + $0x10] sm:$0xff]  ;;  %v14_v2 = vld [vmem:[%s868_s0 + $0x8] sm:$0xff] }
   0x2   :  { %49 = vrot.lane.b32.xlu0 %v13_v0, %s678_s16  ;;  %53 = vrot.lane.b32.xlu1 %v706_v1, %s678_s16  ;;  %v16_v3 = vld [vmem:[%s868_s0 + $0x18] sm:$0xff]  ;;  %v74_v4 = vld [vmem:[%s869_s1 + $0x8] sm:$0xff] }
   0x3   :  { %v549_v5 = vld [vmem:[%s869_s1 + $0x18] sm:$0xff]  ;;  %624 = vmatprep.subr.mxu0 %v74_v4  ;;  %v724_v6 = vld [vmem:[%s869_s1] sm:$0xff]  ;;  %v729_v7 = vld [vmem:[%s869_s1 + $0x10] sm:$0xff]  ;;  %s679_s1 = smov 112  }
   0x4   :  { %637 = vmatprep.subr.mxu1 %v549_v5  ;;  %v17_v8 = vld [vmem:[%s868_s0 + $0x20] sm:$0xff]  ;;  %v18_v9 = vld [vmem:[%s868_s0 + $0x28] sm:$0xff]  ;;  %625 = vmatpush3.msra.mxu0 %v74_v4 }
   0x5   :  { %638 = vmatpush3.msra.mxu1 %v549_v5  ;;  %626 = vmatprep.subr.mxu0 %v724_v6 }
   0x6   :  { %51 = vrot.lane.b32.xlu0 %v14_v2, %s678_s16  ;;  %55 = vrot.lane.b32.xlu1 %v16_v3, %s678_s16 }
   0x7   :  { %639 = vmatprep.subr.mxu1 %v729_v7  ;;  %627 = vmatpush3.msra.mxu0 %v724_v6 }
   0x8   :  { %640 = vmatpush3.msra.mxu1 %v729_v7  ;;  %650 = vmatprep.subr.mxu0 %v74_v4 }
   0x9   :  { %663 = vmatprep.subr.mxu1 %v549_v5 }
   0xa   :  { %57 = vrot.lane.b32.xlu0 %v17_v8, %s678_s16  ;;  %59 = vrot.lane.b32.xlu1 %v18_v9, %s678_s16 }
   0xe   :  { %25 = vrot.lane.b32.xlu0 %v13_v0, %s679_s1  ;;  %27 = vrot.lane.b32.xlu1 %v14_v2, %s679_s1 }
  0x12   :  { %29 = vrot.lane.b32.xlu0 %v706_v1, %s679_s1  ;;  %31 = vrot.lane.b32.xlu1 %v16_v3, %s679_s1 }
  0x16   :  { %33 = vrot.lane.b32.xlu0 %v17_v8, %s679_s1  ;;  %35 = vrot.lane.b32.xlu1 %v18_v9, %s679_s1 }
  0x74   :  { %v50_v10 = vpop.permute.xlu0 %49  ;;  %v54_v11 = vpop.permute.xlu1 %53 }
  0x75   :  { %v67_v12 = vsub.f32 %v13_v0, %v50_v10  ;;  %v69_v13 = vsub.f32 %v706_v1, %v54_v11 }
  0x77   :  { %299 = vrot.lane.b32.xlu0 %v67_v12, %s679_s1 }
  0x78   :  { %v52_v14 = vpop.permute.xlu0 %51  ;;  %v56_v15 = vpop.permute.xlu1 %55 }
  0x79   :  { %v68_v16 = vsub.f32 %v14_v2, %v52_v14  ;;  %v70_v17 = vsub.f32 %v16_v3, %v56_v15 }
  0x7b   :  { %303 = vrot.lane.b32.xlu0 %v69_v13, %s679_s1  ;;  %301 = vrot.lane.b32.xlu1 %v68_v16, %s679_s1 }
  0x7c   :  { %v58_v18 = vpop.permute.xlu0 %57  ;;  %v60_v19 = vpop.permute.xlu1 %59 }
  0x7d   :  { %v71_v20 = vsub.f32 %v17_v8, %v58_v18  ;;  %v72_v21 = vsub.f32 %v18_v9, %v60_v19 }
  0x7f   :  { %305 = vrot.lane.b32.xlu1 %v70_v17, %s679_s1  ;;  %307 = vrot.lane.b32.xlu0 %v71_v20, %s679_s1 }
  0x80   :  { %v26_v22 = vpop.permute.xlu0 %25  ;;  %v28_v23 = vpop.permute.xlu1 %27 }
  0x81   :  { %v43_v24 = vadd.f32 %v26_v22, %v13_v0  ;;  %v44_v25 = vadd.f32 %v28_v23, %v14_v2 }
  0x83   :  { %309 = vrot.lane.b32.xlu1 %v72_v21, %s679_s1  ;;  %628 = vmatprep.mubr.msk.f32.mxu0 %vm78_vm0, %v43_v24 }
  0x84   :  { %641 = vmatprep.mubr.msk.f32.mxu1 %vm78_vm0, %v43_v24  ;;  %629 = vmatmul.mubr.msk.f32.vlgmr.msra.gmra.mxu0 %vm78_vm0, %v44_v25  ;;  %v30_v26 = vpop.permute.xlu0 %29  ;;  %v32_v27 = vpop.permute.xlu1 %31 }
  0x85   :  { %642 = vmatmul.mubr.msk.f32.vlgmr.msra.gmra.mxu1 %vm78_vm0, %v44_v25  ;;  %v45_v28 = vadd.f32 %v30_v26, %v706_v1  ;;  %v46_v29 = vadd.f32 %v32_v27, %v16_v3  ;;  %651 = vmatpush3.msra.mxu0 %v74_v4 }
  0x86   :  { %664 = vmatpush3.msra.mxu1 %v549_v5  ;;  %652 = vmatprep.subr.mxu0 %v724_v6 }
  0x87   :  { %631 = vmatprep.mubr.msk.f32.mxu0 %vm78_vm0, %v45_v28  ;;  %644 = vmatprep.mubr.msk.f32.mxu1 %vm78_vm0, %v45_v28 }
  0x88   :  { %632 = vmatmul.mubr.msk.f32.gmra.mxu0 %vm78_vm0, %v46_v29  ;;  %v34_v30 = vpop.permute.xlu0 %33  ;;  %v36_v31 = vpop.permute.xlu1 %35  ;;  %665 = vmatprep.subr.mxu1 %v729_v7 }
  0x89   :  { %645 = vmatmul.mubr.msk.f32.gmra.mxu1 %vm78_vm0, %v46_v29  ;;  %v47_v32 = vadd.f32 %v34_v30, %v17_v8  ;;  %v48_v33 = vadd.f32 %v36_v31, %v18_v9  ;;  %653 = vmatpush3.msra.mxu0 %v724_v6 }
  0x8a   :  { %666 = vmatpush3.msra.mxu1 %v729_v7 }
  0x8b   :  { %634 = vmatprep.mubr.msk.f32.mxu0 %vm78_vm0, %v47_v32  ;;  %647 = vmatprep.mubr.msk.f32.mxu1 %vm78_vm0, %v47_v32 }
  0x8c   :  { %635 = vmatmul.mubr.msk.f32.gmra.mxu0 %vm78_vm0, %v48_v33 }
  0x8d   :  { %648 = vmatmul.mubr.msk.f32.gmra.mxu1 %vm78_vm0, %v48_v33 }
  0xe9   :  { %v300_v34 = vpop.permute.xlu0 %299 }
  0xea   :  { %654 = vmatprep.mubr.msk.f32.mxu0 %vm78_vm0, %v300_v34  ;;  %667 = vmatprep.mubr.msk.f32.mxu1 %vm78_vm0, %v300_v34 }
  0xed   :  { %v302_v35 = vpop.permute.xlu1 %301  ;;  %v304_v36 = vpop.permute.xlu0 %303 }
  0xee   :  { %655 = vmatmul.mubr.msk.f32.vlgmr.msra.gmra.mxu0 %vm78_vm0, %v302_v35  ;;  %668 = vmatmul.mubr.msk.f32.vlgmr.msra.gmra.mxu1 %vm78_vm0, %v302_v35 }
  0xef   :  { %657 = vmatprep.mubr.msk.f32.mxu0 %vm78_vm0, %v304_v36  ;;  %670 = vmatprep.mubr.msk.f32.mxu1 %vm78_vm0, %v304_v36 }
  0xf1   :  { %v306_v37 = vpop.permute.xlu1 %305  ;;  %v308_v38 = vpop.permute.xlu0 %307 }
  0xf2   :  { %658 = vmatmul.mubr.msk.f32.gmra.mxu0 %vm78_vm0, %v306_v37  ;;  %671 = vmatmul.mubr.msk.f32.gmra.mxu1 %vm78_vm0, %v306_v37 }
  0xf3   :  { %660 = vmatprep.mubr.msk.f32.mxu0 %vm78_vm0, %v308_v38  ;;  %673 = vmatprep.mubr.msk.f32.mxu1 %vm78_vm0, %v308_v38 }
  0xf5   :  { %v310_v39 = vpop.permute.xlu1 %309 }
  0xf6   :  { %661 = vmatmul.mubr.msk.f32.gmra.mxu0 %vm78_vm0, %v310_v39  ;;  %674 = vmatmul.mubr.msk.f32.gmra.mxu1 %vm78_vm0, %v310_v39 }
 0x144   :  { %v630_v40 = vpop.f32.mrf.mxu0 }
 0x145   :  { %v557_v41 = vadd.f32 -2.0, %v630_v40  ;;  %v643_v42 = vpop.f32.mrf.mxu1 }
 0x146   :  { %521 = vst.msk [vmem:[%s870_s3 + $0x8] sm:$0xff] %vm513_vm1, %v643_v42  ;;  %v163_v43 = vpop.f32.mrf.mxu0 }
 0x147   :  { %515 = vst.msk [vmem:[%s871_s2 + $0x8] sm:$0xff] %vm513_vm1, %v557_v41  ;;  %v556_v44 = vadd.f32 -2.0, %v163_v43  ;;  %v264_v45 = vpop.f32.mrf.mxu1 }
 0x148   :  { %520 = vst.msk [vmem:[%s870_s3] sm:$0xff] %vm513_vm1, %v264_v45  ;;  %v633_v46 = vpop.f32.mrf.mxu0 }
 0x149   :  { %514 = vst.msk [vmem:[%s871_s2] sm:$0xff] %vm513_vm1, %v556_v44  ;;  %v559_v47 = vadd.f32 -2.0, %v633_v46  ;;  %v646_v48 = vpop.f32.mrf.mxu1 }
 0x14a   :  { %523 = vst.msk [vmem:[%s870_s3 + $0x18] sm:$0xff] %vm513_vm1, %v646_v48  ;;  %v173_v49 = vpop.f32.mrf.mxu0 }
 0x14b   :  { %517 = vst.msk [vmem:[%s871_s2 + $0x18] sm:$0xff] %vm513_vm1, %v559_v47  ;;  %v558_v50 = vadd.f32 -2.0, %v173_v49  ;;  %v274_v51 = vpop.f32.mrf.mxu1 }
 0x14c   :  { %522 = vst.msk [vmem:[%s870_s3 + $0x10] sm:$0xff] %vm513_vm1, %v274_v51  ;;  %v636_v52 = vpop.f32.mrf.mxu0 }
 0x14d   :  { %516 = vst.msk [vmem:[%s871_s2 + $0x10] sm:$0xff] %vm513_vm1, %v558_v50  ;;  %v561_v53 = vadd.f32 -2.0, %v636_v52  ;;  %v649_v54 = vpop.f32.mrf.mxu1 }
 0x14e   :  { %525 = vst.msk [vmem:[%s870_s3 + $0x28] sm:$0xff] %vm513_vm1, %v649_v54  ;;  %v183_v55 = vpop.f32.mrf.mxu0 }
 0x14f   :  { %519 = vst.msk [vmem:[%s871_s2 + $0x28] sm:$0xff] %vm513_vm1, %v561_v53  ;;  %v560_v56 = vadd.f32 -2.0, %v183_v55  ;;  %v284_v57 = vpop.f32.mrf.mxu1 }
 0x150   :  { %524 = vst.msk [vmem:[%s870_s3 + $0x20] sm:$0xff] %vm513_vm1, %v284_v57 }
 0x151   :  { %518 = vst.msk [vmem:[%s871_s2 + $0x20] sm:$0xff] %vm513_vm1, %v560_v56 }
 0x1ae   :  { %v656_v58 = vpop.f32.mrf.mxu0  ;;  %v669_v59 = vpop.f32.mrf.mxu1 }
 0x1af   :  { %581 = vst.msk [vmem:[%s870_s3 + $0x38] sm:$0xff] %vm513_vm1, %v656_v58  ;;  %587 = vst.msk [vmem:[%s870_s3 + $0x68] sm:$0xff] %vm513_vm1, %v669_v59 }
 0x1b0   :  { %v389_v60 = vpop.f32.mrf.mxu0  ;;  %v484_v61 = vpop.f32.mrf.mxu1 }
 0x1b1   :  { %580 = vst.msk [vmem:[%s870_s3 + $0x30] sm:$0xff] %vm513_vm1, %v389_v60  ;;  %586 = vst.msk [vmem:[%s870_s3 + $0x60] sm:$0xff] %vm513_vm1, %v484_v61 }
 0x1b2   :  { %v659_v62 = vpop.f32.mrf.mxu0  ;;  %v672_v63 = vpop.f32.mrf.mxu1 }
 0x1b3   :  { %583 = vst.msk [vmem:[%s870_s3 + $0x48] sm:$0xff] %vm513_vm1, %v659_v62  ;;  %589 = vst.msk [vmem:[%s870_s3 + $0x78] sm:$0xff] %vm513_vm1, %v672_v63 }
 0x1b4   :  { %v399_v0 = vpop.f32.mrf.mxu0  ;;  %v494_v1 = vpop.f32.mrf.mxu1 }
 0x1b5   :  { %582 = vst.msk [vmem:[%s870_s3 + $0x40] sm:$0xff] %vm513_vm1, %v399_v0  ;;  %588 = vst.msk [vmem:[%s870_s3 + $0x70] sm:$0xff] %vm513_vm1, %v494_v1 }
 0x1b6   :  { %v662_v2 = vpop.f32.mrf.mxu0  ;;  %v675_v3 = vpop.f32.mrf.mxu1 }
 0x1b7   :  { %585 = vst.msk [vmem:[%s870_s3 + $0x58] sm:$0xff] %vm513_vm1, %v662_v2  ;;  %591 = vst.msk [vmem:[%s870_s3 + $0x88] sm:$0xff] %vm513_vm1, %v675_v3 }
 0x1b8   :  { %v409_v4 = vpop.f32.mrf.mxu0  ;;  %v504_v5 = vpop.f32.mrf.mxu1 }
 0x1b9   :  { %584 = vst.msk [vmem:[%s870_s3 + $0x50] sm:$0xff] %vm513_vm1, %v409_v4  ;;  %590 = vst.msk [vmem:[%s870_s3 + $0x80] sm:$0xff] %vm513_vm1, %v504_v5 }

</bundles_post_ra>
